<compile_context>
chip_gen: v7x
topology: tpu7x:2x2x1
jax: 0.10.0
libtpu: 0.0.40
codegen_flags: <defaults>
</compile_context>

<pallas_src>
import functools
import math

import jax
import jax.numpy as jnp
from jax.experimental import pallas as pl
from jax.experimental.pallas import tpu as pltpu


def _embedding_kernel(ids_ref, emb_hbm, o_ref, row_buf, sems, *, tm, scale):
    """Gather `tm` embedding rows for this grid step, scale, store densely.

    ids_ref : SMEM (M_pad,) int32 token ids (scalar-prefetched)
    emb_hbm : HBM  (vocab, d_model) embedding table (memory_space=pl.ANY)
    o_ref   : VMEM (tm, d_model) output block
    row_buf : VMEM (tm, d_model) gather landing buffer (scratch)
    sems    : DMA semaphores, shape (tm,)
    """
    base = pl.program_id(0) * tm

    # Issue all row-gather DMAs up front so they overlap one another (and the
    # previous block's output writeback handled by the BlockSpec pipeline).
    @pl.loop(0, tm)
    def _start(t):
        tok = ids_ref[base + t]
        pltpu.make_async_copy(
            emb_hbm.at[pl.ds(tok, 1), :],
            row_buf.at[pl.ds(t, 1), :],
            sems.at[t],
        ).start()

    # Wait for every row, then scale and write one dense (tm, d_model) block.
    @pl.loop(0, tm)
    def _wait(t):
        pltpu.make_async_copy(
            emb_hbm.at[pl.ds(0, 1), :],
            row_buf.at[pl.ds(t, 1), :],
            sems.at[t],
        ).wait()

    o_ref[...] = (row_buf[...].astype(jnp.float32) * scale).astype(o_ref.dtype)


def embeddings(ids, emb_table, *, tm=None):
    """ids: (B, S) int. emb_table: (vocab, d_model). Returns (B, S, d_model)."""
    B, S = ids.shape
    vocab, d_model = emb_table.shape
    scale = math.sqrt(d_model)

    M = B * S
    if tm is None:
        tm = min(256, max(8, M))
    tm = max(8, (tm // 8) * 8)            # sublane-aligned token tile

    m_pad = pl.cdiv(M, tm) * tm
    ids_flat = ids.reshape(M).astype(jnp.int32)
    if m_pad != M:                        # pad with a valid id; sliced off below
        ids_flat = jnp.concatenate(
            [ids_flat, jnp.zeros((m_pad - M,), jnp.int32)])

    itemsize = jnp.dtype(emb_table.dtype).itemsize
    kernel = functools.partial(_embedding_kernel, tm=tm, scale=scale)

    out = pl.pallas_call(
        kernel,
        out_shape=jax.ShapeDtypeStruct((m_pad, d_model), emb_table.dtype),
        grid_spec=pltpu.PrefetchScalarGridSpec(
            num_scalar_prefetch=1,                       # ids -> SMEM
            grid=(m_pad // tm,),
            in_specs=[pl.BlockSpec(memory_space=pl.ANY)],  # table stays in HBM
            out_specs=pl.BlockSpec((tm, d_model), lambda i, ids: (i, 0)),
            scratch_shapes=[
                pltpu.VMEM((tm, d_model), emb_table.dtype),
                pltpu.SemaphoreType.DMA((tm,)),
            ],
        ),
        compiler_params=pltpu.CompilerParams(
            dimension_semantics=("parallel",)),
        cost_estimate=pl.CostEstimate(
            flops=M * d_model,
            transcendentals=0,
            bytes_accessed=(m_pad * 4                      # ids
                            + m_pad * d_model * itemsize   # gathered rows
                            + m_pad * d_model * itemsize), # output
        ),
    )(ids_flat, emb_table)

    return out[:M].reshape(B, S, d_model)


def init_params(key, vocab_size, d_model, dtype=jnp.float32):
    """nn.Embedding default init: weights ~ N(0, 1)."""
    return jax.random.normal(key, (vocab_size, d_model), dtype)


def _reference(ids, emb_table):
    d_model = emb_table.shape[1]
    return emb_table[ids] * math.sqrt(d_model)


if __name__ == "__main__":
    B, S, d_model, vocab_size = 2, 8, 128, 64
    key = jax.random.PRNGKey(0)
    k_ids, k_emb = jax.random.split(key)

    ids = jax.random.randint(k_ids, (B, S), 0, vocab_size, dtype=jnp.int32)
    emb_table = init_params(k_emb, vocab_size, d_model, jnp.float32)

    # tm=8 -> grid=(2,) so the tiled / pipelined path is exercised even at toy M.
    out = embeddings(ids, emb_table, tm=8)
    out = jax.block_until_ready(out)

    ref = _reference(ids, emb_table)
    assert out.shape == (B, S, d_model)
    assert jnp.allclose(out, ref, atol=1e-5, rtol=1e-5)
    print("KERNEL_OK")
</pallas_src>

<mosaic_0001>
module attributes {stable_mosaic.version = 11 : i64} {
  func.func @_embedding_kernel(%arg0: i32, %arg1: memref<16xi32, #tpu.memory_space<smem>>, %arg2: memref<64x128xf32, #tpu.memory_space<any>>, %arg3: memref<8x128xf32, #tpu.memory_space<vmem>>, %arg4: memref<8x128xf32, #tpu.memory_space<vmem>>, %arg5: memref<8x!tpu.dma_semaphore, #tpu.memory_space<semaphore_mem>>) attributes {dimension_semantics = [#tpu.dimension_semantics<parallel>], iteration_bounds = array<i64: 2>, scalar_prefetch = 1 : i64, scratch_operands = 2 : i64, tpu.core_type = #tpu.core_type<tc>, window_params = [{}, {transform_indices = @transform_1, window_bounds = array<i64: 8, 128>}]} {
    %c8_i32 = arith.constant 8 : i32
    %0 = arith.muli %arg0, %c8_i32 : i32
    %c0_i32 = arith.constant 0 : i32
    %c8_i32_0 = arith.constant 8 : i32
    %1 = arith.addi %c0_i32, %c8_i32_0 : i32
    %c1_i32 = arith.constant 1 : i32
    scf.for %arg6 = %c0_i32 to %1 step %c1_i32  : i32 {
      %c1_i32_9 = arith.constant 1 : i32
      %7 = arith.muli %arg6, %c1_i32_9 : i32
      %c0_i32_10 = arith.constant 0 : i32
      %8 = arith.addi %c0_i32_10, %7 : i32
      %9 = arith.addi %0, %8 : i32
      %10 = arith.index_cast %9 : i32 to index
      %11 = memref.load %arg1[%10] : memref<16xi32, #tpu.memory_space<smem>>
      %c0_i32_11 = arith.constant 0 : i32
      %12 = tpu.memref_slice %arg2[%11, %c0_i32_11] : memref<64x128xf32, #tpu.memory_space<any>> -> memref<1x128xf32, #tpu.memory_space<any>>
      %c0_i32_12 = arith.constant 0 : i32
      %13 = tpu.memref_slice %arg4[%8, %c0_i32_12] : memref<8x128xf32, #tpu.memory_space<vmem>> -> memref<1x128xf32, #tpu.memory_space<vmem>>
      %14 = tpu.memref_slice %arg5[%8] : memref<8x!tpu.dma_semaphore, #tpu.memory_space<semaphore_mem>> -> memref<1x!tpu.dma_semaphore, #tpu.memory_space<semaphore_mem>>
      %15 = tpu.memref_squeeze %14 : memref<1x!tpu.dma_semaphore, #tpu.memory_space<semaphore_mem>> -> memref<!tpu.dma_semaphore, #tpu.memory_space<semaphore_mem>>
      tpu.enqueue_dma source(%12 : memref<1x128xf32, #tpu.memory_space<any>>) target(%13 : memref<1x128xf32, #tpu.memory_space<vmem>>) target_semaphore(%15 : memref<!tpu.dma_semaphore, #tpu.memory_space<semaphore_mem>>)
    }
    %c8_i32_1 = arith.constant 8 : i32
    %c0_i32_2 = arith.constant 0 : i32
    %c8_i32_3 = arith.constant 8 : i32
    %2 = arith.addi %c0_i32_2, %c8_i32_3 : i32
    %c1_i32_4 = arith.constant 1 : i32
    scf.for %arg6 = %c0_i32_2 to %2 step %c1_i32_4  : i32 {
      %c1_i32_9 = arith.constant 1 : i32
      %7 = arith.muli %arg6, %c1_i32_9 : i32
      %c0_i32_10 = arith.constant 0 : i32
      %8 = arith.addi %c0_i32_10, %7 : i32
      %c0_i32_11 = arith.constant 0 : i32
      %c0_i32_12 = arith.constant 0 : i32
      %9 = tpu.memref_slice %arg2[%c0_i32_11, %c0_i32_12] : memref<64x128xf32, #tpu.memory_space<any>> -> memref<1x128xf32, #tpu.memory_space<any>>
      %c0_i32_13 = arith.constant 0 : i32
      %10 = tpu.memref_slice %arg4[%8, %c0_i32_13] : memref<8x128xf32, #tpu.memory_space<vmem>> -> memref<1x128xf32, #tpu.memory_space<vmem>>
      %11 = tpu.memref_slice %arg5[%8] : memref<8x!tpu.dma_semaphore, #tpu.memory_space<semaphore_mem>> -> memref<1x!tpu.dma_semaphore, #tpu.memory_space<semaphore_mem>>
      %12 = tpu.memref_squeeze %11 : memref<1x!tpu.dma_semaphore, #tpu.memory_space<semaphore_mem>> -> memref<!tpu.dma_semaphore, #tpu.memory_space<semaphore_mem>>
      tpu.wait_dma2 semaphore(%12 : memref<!tpu.dma_semaphore, #tpu.memory_space<semaphore_mem>>) src(%9 : memref<1x128xf32, #tpu.memory_space<any>>) dst(%10 : memref<1x128xf32, #tpu.memory_space<vmem>>)
    }
    %c8_i32_5 = arith.constant 8 : i32
    %c0 = arith.constant 0 : index
    %c0_6 = arith.constant 0 : index
    %3 = vector.load %arg4[%c0, %c0_6] : memref<8x128xf32, #tpu.memory_space<vmem>>, vector<8x128xf32>
    %cst = arith.constant 11.3137083 : f32
    %4 = vector.broadcast %cst : f32 to vector<8x128xf32>
    %5 = arith.mulf %3, %4 : vector<8x128xf32>
    %c0_7 = arith.constant 0 : index
    %c0_8 = arith.constant 0 : index
    %6 = vector.load %arg3[%c0_7, %c0_8] : memref<8x128xf32, #tpu.memory_space<vmem>>, vector<8x128xf32>
    tpu.vector_store %arg3[%c0_7, %c0_8], %5 {strides = array<i32>} : memref<8x128xf32, #tpu.memory_space<vmem>>, vector<8x128xf32>,
    return
  }
  func.func @transform_1(%arg0: i32, %arg1: memref<16xi32, #tpu.memory_space<smem>>) -> (i32, i32) {
    %c0_i32 = arith.constant 0 : i32
    %c0_i32_0 = arith.constant 0 : i32
    return %arg0, %c0_i32 : i32, i32
  }
}

</mosaic_0001>

<bundles_post_ra>
// kernel: tpu_custom_call.1
= control target key start
LH: loop header
LB: loop body
LE: loop exit
PB: predicated region body
PF: predicated region fallthrough
CT: control target
= control target key end

     0   :  { %s537_s0 = inlined_call_operand.hbm [shape: s32[16], index: 0, kind: input, shape index: {}]   ;;  %s538_s1 = inlined_call_operand.hbm [shape: f32[64,128], index: 1, kind: input, shape index: {}]   ;;  %s539_s2 = inlined_call_operand.hbm [shape: f32[16,128], index: 2, kind: output, shape index: {}]  }
   0x1   :  { %s282_s11 = scalar_lea.hbm %s537_s0, 16 }
   0x2   :  { %p283_p0 = scmp.ne.s32.totalorder %s537_s0, %s282_s11  ;;  %p286_p1 = scmp.lt.u32.totalorder %s282_s11, %s537_s0 }
   0x4   :  { %p288_p2 = pnand %p286_p1, %p283_p0 }
   0x6   :  { %291 = shalt.err (!%p288_p2)  }
   0x7   :  { %s392_s16 = smov [#allocation5]  }
   0x8   :  { %8 = dma.hbm_to_smem %s537_s0, 16, %s392_s16, [#allocation4] }
   0x9   :  { %364 = dma.done.wait [#allocation4], 16 }
   0xa   :  { %365 = vsyncadd [#allocation4], 4294967280 }
   0xb   :  { %10 = sfence }
   0xc   :  { %11 = vsyncpa [#allocation7], 0 }
   0xd   :  { %13 = vsyncpa [#allocation7 + $0x1], 0  ;;  %s422_s19 = smov 0   ;;  %s424_s20 = smov 0  }
   0xe   :  { %s426_s21 = smov 0  }
   0xf LB: > { %s216_s0 = sadd.s32 4294967295, %s382_s21   ;;  %s439_s22 = sadd.s32 1, %s382_s21   ;;  %s382_s21 = sphi %s426_s21, %s545_s21   ;;  %s378_s20 = sphi %s424_s20, %s544_s20   ;;  %s374_s19 = sphi %s422_s19, %s543_s19  }
  0x10   : > { %s22_s23 = ssub.s32 %s382_s21, %s439_s22  ;;  %s25_s24 = sadd.s32 1, %s378_s20 }
  0x11   : > { %p23_p3 = scmp.eq.s32.totalorder %s22_s23, 0  ;;  %p217_p4 = scmp.ne.s32.totalorder %s22_s23, 0 }
  0x12   : > { %p29_p5 = scmp.eq.s32.totalorder %s382_s21, 1  ;;  %p34_p6 = scmp.ne.s32.totalorder %s378_s20, %s374_s19 }
  0x13   : > { %s448_s25 = scalar_select %p23_p3, %s378_s20, %s25_s24  }
  0x14   : > { %p450_p7 = por %p217_p4, %p29_p5  ;;  %p35_p8 = scmp.eq.s32.totalorder %s216_s0, 1 }
  0x15   : > { %p218_p10 = scmp.ge.s32.totalorder %s382_s21, 2 }
  0x16   : > { %p454_p9 = por %p35_p8, %p34_p6  ;;  %s49_s28 = sand.u32 (!%p218_p10), 1, %s378_s20  }
  0x17   : > { %44 = sbr.rel (%p218_p10) target bundleno = 99 (0x63), region = 12  ;;  %s220_s29 = sshll.u32 (!%p218_p10), %s382_s21, 3 }
  0x18   : > { %s541_s27 = scalar_select %p454_p9, 1, 0 }
  0x19   : > { %s463_s30 = sshll.u32 (!%p218_p10), %s49_s28, 3  ;;  %s466_s4 = smov (!%p218_p10), 0  }
  0x1a   : > { %s51_s3 = scalar_lea.vmem (!%p218_p10), [#allocation6], %s463_s30 }
  0x1e LB: >> { %s59_s5 = sadd.s32 %s386_s4, %s220_s29  ;;  %s63_s7 = scalar_lea.vmem [#allocation2], %s386_s4  ;;  %s386_s4 = sphi %s466_s4, %s58_s4  }
  0x1f   : >> { %s60_s6 = sld [smem:[#allocation5 + %s59_s5]]  ;;  %s72_s8 = sshll.u32 %s63_s7, 4  ;;  %s73_s8 = int_to_ptr.vmem [resolvable:$true] %s72_s8 }
  0x20   : >> { %s64_s13 = scalar_lea.sflag [#allocation3], %s386_s4  ;;  %s294_s17 = scalar_lea.hbm %s538_s1, 1024 }
  0x25   : >> { %s221_s9 = sshll.u32 %s60_s6, 4 }
  0x26   : >> { %s62_s12 = scalar_lea.hbm %s538_s1, %s221_s9 }
  0x27   : >> { %s292_s14 = scalar_lea.hbm %s62_s12, 16  ;;  %p295_p12 = scmp.lt.u32.totalorder %s62_s12, %s538_s1 }
  0x28   : >> { %p293_p11 = scmp.ne.s32.totalorder %s62_s12, %s292_s14  ;;  %p296_p13 = scmp.lt.u32.totalorder %s294_s17, %s292_s14 }
  0x29   : >> { %p298_p1 = scmp.lt.u32.totalorder %s292_s14, %s62_s12 }
  0x2a   : >> { %p297_p0 = por %p296_p13, %p295_p12 }
  0x2c   : >> { %p299_p2 = por %p298_p1, %p297_p0 }
  0x2e   : >> { %p300_p3 = pnand %p299_p2, %p293_p11 }
  0x30   : >> { %303 = shalt.err (!%p300_p3)  }
  0x31   : >> { %s304_s23 = scalar_lea.vmem %s73_s8, 16  ;;  %s393_s24 = smov [#allocation2]  }
  0x32   : >> { %p305_p4 = scmp.ne.s32.totalorder %s73_s8, %s304_s23  ;;  %s306_s5 = sshll.u32 %s393_s24, 4  ;;  %s307_s5 = int_to_ptr.vmem [resolvable:$false] %s306_s5 }
  0x33   : >> { %s308_s6 = scalar_lea.vmem %s307_s5, 128  ;;  %p309_p5 = scmp.lt.s32.totalorder %s73_s8, %s307_s5 }
  0x34   : >> { %p310_p6 = scmp.lt.s32.totalorder %s308_s6, %s304_s23 }
  0x36   : >> { %p311_p8 = por %p310_p6, %p309_p5 }
  0x38   : >> { %p312_p10 = pnand %p311_p8, %p305_p4 }
  0x3a   : >> { %315 = shalt.err (!%p312_p10)  }
  0x3b   : >> { %75 = dma.hbm_to_vmem [thread:$0]  %s62_s12, 16, %s73_s8, %s64_s13 }
  0x3c   : >> { %s58_s4 = sadd.s32 1, %s386_s4  }
  0x3d   : >> { %p55_p9 = scmp.ge.s32.totalorder %s58_s4, 8  }
  0x3e   : > { %s388_s7 = smov (%p55_p9), 0  }
  0x3f   : > { %57 = sbr.rel (!%p55_p9) target bundleno = 30 (0x1e), region = 73 }
  0x46 LB: >> { %s82_s9 = scalar_lea.sflag [#allocation3], %s390_s7  ;;  %s390_s7 = sphi %s388_s7, %s81_s7  }
  0x47   : >> { %366 = dma.done.wait %s82_s9, 16 }
  0x48   : >> { %367 = vsyncadd %s82_s9, 4294967280  ;;  %s81_s7 = sadd.s32 1, %s390_s7  }
  0x49   : >> { %p78_p11 = scmp.ge.s32.totalorder %s81_s7, 8  }
  0x4a   : > { %v86_v0 = vld [vmem:[#allocation2] sm:$0xff] (%p78_p11)  ;;  %s223_s8 = sshll.u32 (%p78_p11), %s382_s21, 7  ;;  %s103_s11 = sshll.u32 (%p78_p11), %s51_s3, 4  ;;  %s496_s11 = int_to_ptr.vmem [resolvable:$true] %s103_s11 }
  0x4b   : > { %80 = sbr.rel (!%p78_p11) target bundleno = 70 (0x46), region = 84  ;;  %v87_v1 = vmul.f32 (%p78_p11), 11.313708, %v86_v0  ;;  %s492_s10 = scalar_lea.hbm (%p78_p11), %s539_s2, %s223_s8 }
  0x4c   : > { %s90_s12 = scalar_lea.sflag (%p78_p11), [#allocation7], %s49_s28  ;;  %s316_s13 = scalar_lea.vmem (%p78_p11), %s496_s11, 128 }
  0x4d   : > { %88 = vst [vmem:[%s51_s3] sm:$0xff] (%p78_p11), %v87_v1  ;;  %p317_p9 = scmp.ne.s32.totalorder (%p78_p11), %s496_s11, %s316_s13  ;;  %s394_s14 = smov (%p78_p11), [#allocation6]  }
  0x4e   : > { %s320_s15 = sshll.u32 (%p78_p11), %s394_s14, 4  ;;  %s321_s15 = int_to_ptr.vmem [resolvable:$false] %s320_s15 }
  0x4f   : > { %p318_p12 = pnand (%p78_p11), %p317_p9, %p450_p7  ;;  %s322_s16 = scalar_lea.vmem (%p78_p11), %s321_s15, 256 }
  0x50   : > { %p323_p0 = scmp.lt.s32.totalorder (%p78_p11), %s496_s11, %s321_s15  ;;  %p324_p1 = scmp.lt.s32.totalorder (%p78_p11), %s322_s16, %s316_s13 }
  0x51   : > { %p319_p13 = pneg (%p78_p11), %p318_p12 }
  0x52   : > { %p325_p2 = por %p324_p1, %p323_p0 }
  0x54   : > { %p326_p3 = pnand %p325_p2, %p319_p13 }
  0x56   : > { %329 = shalt.err (!%p326_p3)
}
  0x57   : > { %s330_s28 = scalar_lea.hbm %s492_s10, 128  ;;  %s334_s17 = scalar_lea.hbm %s539_s2, 256 }
  0x58   : > { %p331_p4 = scmp.ne.s32.totalorder %s492_s10, %s330_s28  ;;  %p335_p8 = scmp.lt.u32.totalorder %s492_s10, %s539_s2 }
  0x59   : > { %p336_p10 = scmp.lt.u32.totalorder %s334_s17, %s330_s28  ;;  %p338_p9 = scmp.lt.u32.totalorder %s330_s28, %s492_s10 }
  0x5a   : > { %p332_p5 = pnand %p331_p4, %p450_p7 }
  0x5b   : > { %p337_p11 = por %p336_p10, %p335_p8 }
  0x5c   : > { %p333_p6 = pneg %p332_p5 }
  0x5d   : > { %p339_p12 = por %p338_p9, %p337_p11 }
  0x5f   : > { %p340_p13 = pnand %p339_p12, %p333_p6 }
  0x61   : > { %343 = shalt.err (!%p340_p13)
}
  0x62   : > { %234 = dma.vmem_to_hbm [thread:$0]  (%p450_p7), %s496_s11, 128, %s492_s10, %s90_s12  }
  0x63 PF: > { %p240_p0 = scmp.ge.s32.totalorder %s382_s21, 1  ;;  %s115_s23 = sand.u32 1, %s374_s19  }
  0x64   : > { %p542_p1 = scmp.ne.s32.totalorder %s541_s27, 0  ;;  %s116_s24 = scalar_lea.sflag [#allocation7], %s115_s23 }
  0x66   : > { %p237_p2 = pnand %p240_p0, %p542_p1 }
  0x68   : > { %369 = dma.done.wait (!%p237_p2), %s116_s24, 128  }
  0x69   : > { %371 = vsyncadd (!%p237_p2), %s116_s24, 4294967168  ;;  %p16_p3 = scmp.ge.s32.totalorder %s439_s22, 3   ;;  %s543_s19 = smov %s378_s20 }
  0x6a   : > { %s544_s20 = smov %s448_s25  ;;  %s545_s21 = smov %s439_s22 }
  0x6b   :  { %18 = sbr.rel (!%p16_p3) target bundleno = 15 (0xf), region = 95 }
  0x72   :  { %121 = vsyncpa [#allocation7], 1 }
  0x73   :  { %123 = vsyncpa [#allocation7 + $0x1], 1 }
  0x74   :  { %124 = vsyncmov [#allocation3] }
  0x77   :  { %s125_s21 = vpop.sfrf %124 }
  0x78   :  { %p226_p7 = scmp.ne.s32.totalorder %s125_s21, 0 }
  0x7a   :  { %129 = shalt.err (%p226_p7)  }
  0x7b   :  { %131 = vsyncmov [#allocation3 + $0x1] }
  0x7e   :  { %s132_s26 = vpop.sfrf %131 }
  0x7f   :  { %p227_p4 = scmp.ne.s32.totalorder %s132_s26, 0 }
  0x81   :  { %136 = shalt.err (%p227_p4)  }
  0x82   :  { %138 = vsyncmov [#allocation3 + $0x2] }
  0x85   :  { %s139_s27 = vpop.sfrf %138 }
  0x86   :  { %p228_p5 = scmp.ne.s32.totalorder %s139_s27, 0 }
  0x88   :  { %143 = shalt.err (%p228_p5)  }
  0x89   :  { %145 = vsyncmov [#allocation3 + $0x3] }
  0x8c   :  { %s146_s5 = vpop.sfrf %145 }
  0x8d   :  { %p229_p6 = scmp.ne.s32.totalorder %s146_s5, 0 }
  0x8f   :  { %150 = shalt.err (%p229_p6)  }
  0x90   :  { %152 = vsyncmov [#allocation3 + $0x4] }
  0x93   :  { %s153_s22 = vpop.sfrf %152 }
  0x94   :  { %p230_p8 = scmp.ne.s32.totalorder %s153_s22, 0 }
  0x96   :  { %157 = shalt.err (%p230_p8)  }
  0x97   :  { %159 = vsyncmov [#allocation3 + $0x5] }
  0x9a   :  { %s160_s1 = vpop.sfrf %159 }
  0x9b   :  { %p231_p10 = scmp.ne.s32.totalorder %s160_s1, 0 }
  0x9d   :  { %164 = shalt.err (%p231_p10)  }
  0x9e   :  { %166 = vsyncmov [#allocation3 + $0x6] }
  0xa1   :  { %s167_s2 = vpop.sfrf %166 }
  0xa2   :  { %p232_p11 = scmp.ne.s32.totalorder %s167_s2, 0 }
  0xa4   :  { %171 = shalt.err (%p232_p11)  }
  0xa5   :  { %173 = vsyncmov [#allocation3 + $0x7] }
  0xa8   :  { %s174_s19 = vpop.sfrf %173 }
  0xa9   :  { %p233_p9 = scmp.ne.s32.totalorder %s174_s19, 0 }
  0xab   :  { %178 = shalt.err (%p233_p9)  }

</bundles_post_ra>
